<compile_context>
chip_gen: v7x
topology: tpu7x:2x2x1
jax: 0.10.0
libtpu: 0.0.40
codegen_flags: <defaults>
</compile_context>

<pallas_src>
import functools
import math

import jax
import jax.numpy as jnp
import numpy as np
from jax.experimental import pallas as pl
from jax.experimental.pallas import tpu as pltpu

_LANE = 128
_VMEM_BUDGET = 8 * 1024 * 1024  # conservative: fits v5e's 16 MiB default scoped VMEM


# ----------------------------- kernel ---------------------------------------
def _merge_kernel(op, n_in, *refs):
    """Fused N-ary left-fold elementwise merge with in-kernel broadcasting."""
    out_ref = refs[n_in]
    acc = refs[0][...]
    for idx in range(1, n_in):
        b = refs[idx][...]
        if op == "add":
            acc = acc + b
        elif op == "sub":
            acc = acc - b
        elif op == "mul":
            acc = acc * b
        elif op == "div":
            # NOTE: exact division kept (kernel is mem-bound; EUP slot has slack).
            acc = acc / b
        else:
            raise ValueError(op)
    out_ref[...] = jnp.broadcast_to(acc, out_ref.shape).astype(out_ref.dtype)


# ----------------------------- shape plumbing --------------------------------
def _left_pad(shape, rank):
    return (1,) * (rank - len(shape)) + tuple(int(d) for d in shape)


def _collapse(out_shape, in_shapes):
    """Merge adjacent output axes on which every operand is consistently either
    fully present or fully broadcast, minimizing rank and maximizing the
    lane-dense trailing axis. Pure metadata (reshapes are free on contiguous
    arrays) -> no extra HBM traffic."""
    rank = len(out_shape)
    if rank == 0:
        return (1,), [(1,) for _ in in_shapes]

    def stat(s, d):
        if out_shape[d] == 1:
            return None  # wildcard: collapsible with anything
        return "P" if s[d] == out_shape[d] else "B"

    groups = [[0]]
    cur_stat = [stat(s, 0) for s in in_shapes]
    for d in range(1, rank):
        st = [stat(s, d) for s in in_shapes]
        ok = all(a is None or b is None or a == b for a, b in zip(cur_stat, st))
        if ok:
            groups[-1].append(d)
            cur_stat = [a if a is not None else b for a, b in zip(cur_stat, st)]
        else:
            groups.append([d])
            cur_stat = st

    new_out = tuple(int(math.prod(out_shape[d] for d in g)) for g in groups)
    new_ins = [tuple(int(math.prod(s[d] for d in g)) for g in groups) for s in in_shapes]
    return new_out, new_ins


# ----------------------------- public API ------------------------------------
def pallas_layer_forward(x):
    """Base `Layer.forward` on a plain tensor: call(inputs) -> identity.
    Pure passthrough -> no kernel / no HBM traffic."""
    return x


def pallas_merge(op, inputs):
    """_Merge.merge_function: fused left-fold pairwise op with broadcasting."""
    arrs = [jnp.asarray(x) for x in inputs]
    if len(arrs) == 1:
        return arrs[0]

    out_shape = jnp.broadcast_shapes(*[a.shape for a in arrs])
    out_dtype = jnp.result_type(*arrs)
    if op == "div" and not jnp.issubdtype(out_dtype, jnp.inexact):
        out_dtype = jnp.float32  # torch.divide always true-divides
    rank0 = len(out_shape)

    padded = [_left_pad(a.shape, rank0) for a in arrs]
    oshape, ishapes = _collapse(out_shape, padded)

    # Fully-collapsed 1-D view -> wide lane-dense 2-D slab when size permits.
    if len(oshape) == 1:
        n = oshape[0]
        for w in (4096, 2048, 1024, 512, 256, 128):
            if n % w == 0:
                oshape = (n // w, w)
                ishapes = [(n // w, w) if s[0] == n else (1, 1) for s in ishapes]
                break
        else:
            # Non-128-divisible flat size: single-row slab, lane axis tiled
            # below with a cdiv grid so large ragged inputs still fit VMEM.
            oshape = (1, n)
            ishapes = [(1, s[0]) for s in ishapes]

    rank = len(oshape)
    mid = int(math.prod(oshape[1:-1])) if rank > 2 else 1
    itemsizes = [jnp.dtype(a.dtype).itemsize for a in arrs] + [jnp.dtype(out_dtype).itemsize]
    out_itemsize = jnp.dtype(out_dtype).itemsize
    # sublane quantum only binds when the leading axis is the second-to-last dim
    row_quantum = (32 // min(itemsizes)) if rank == 2 else 1

    # Per-buffer byte target so (n_inputs + 1) * 2 (double-buffer) fits the budget.
    target = max(_VMEM_BUDGET // (2 * (len(arrs) + 1)), 128 * 1024)

    # Lane-axis block: full extent if it fits, otherwise a multiple of 128.
    last = oshape[-1]
    rows_lb = min(row_quantum, oshape[0])
    if rows_lb * mid * last * out_itemsize <= target or last <= _LANE:
        col_block = last
    else:
        col_block = max(_LANE, (target // (rows_lb * mid * out_itemsize)) // _LANE * _LANE)
        col_block = min(col_block, last)
    # TODO(synk): a single enormous *middle* collapsed axis is not tiled here;
    # realistic merge shapes collapse to <=3 moderate axes so this never binds.

    # Leading-axis block.
    bytes_per_row = mid * col_block * out_itemsize
    row_block = max(row_quantum, int(target // max(bytes_per_row, 1)))
    if rank == 2:
        row_block = max(row_quantum, (row_block // row_quantum) * row_quantum)
    if row_block >= oshape[0]:
        row_block = oshape[0]

    grid = (pl.cdiv(oshape[0], row_block), pl.cdiv(last, col_block))
    zeros_mid = (0,) * (rank - 2)

    def _in_spec(ishape):
        b0 = ishape[0] == 1
        bl = ishape[-1] == 1
        blk = ((1 if b0 else row_block),) + tuple(ishape[1:-1]) + ((1 if bl else col_block),)

        def imap(i, j, _b0=b0, _bl=bl):
            return ((0 if _b0 else i),) + zeros_mid + ((0 if _bl else j),)

        return pl.BlockSpec(blk, imap)

    out_blk = (row_block,) + tuple(oshape[1:-1]) + (col_block,)
    out_spec = pl.BlockSpec(out_blk, lambda i, j: (i,) + zeros_mid + (j,))

    kernel = functools.partial(_merge_kernel, op, len(arrs))
    flat = pl.pallas_call(
        kernel,
        out_shape=jax.ShapeDtypeStruct(oshape, out_dtype),
        grid=grid,
        in_specs=[_in_spec(s) for s in ishapes],
        out_specs=out_spec,
        compiler_params=pltpu.CompilerParams(
            dimension_semantics=("parallel", "parallel")),
    )(*[a.reshape(s) for a, s in zip(arrs, ishapes)])
    return flat.reshape(out_shape)


pallas_add = functools.partial(pallas_merge, "add")
pallas_subtract = functools.partial(pallas_merge, "sub")
pallas_multiply = functools.partial(pallas_merge, "mul")
pallas_divide = functools.partial(pallas_merge, "div")

# TODO(synk): the GraphNode symbolic-graph bookkeeping (shape inference, node
# wiring) and the generic Lambda wrapper in Layer.forward carry no tensor
# compute and therefore have no Pallas equivalent; only the tensor path
# (call -> module) is implemented here.


if __name__ == "__main__":
    key = jax.random.PRNGKey(0)
    k1, k2, k3 = jax.random.split(key, 3)

    # Small NCHW inputs consistent with the module's elementwise semantics.
    x = jax.random.normal(k1, (2, 4, 16, 16), dtype=jnp.float32)
    y = jax.random.normal(k2, (2, 4, 16, 16), dtype=jnp.float32)
    # broadcastable per-channel tensor (exercises _Merge broadcasting rules)
    c = jax.random.normal(k3, (1, 4, 1, 1), dtype=jnp.float32) + 2.0

    # Base Layer forward: identity (no-op passthrough).
    out_id = jax.block_until_ready(pallas_layer_forward(x))
    np.testing.assert_allclose(np.asarray(out_id), np.asarray(x), rtol=0, atol=0)

    # Merge subclasses (fused N-ary kernel, in-kernel broadcasting).
    out_add = jax.block_until_ready(pallas_add([x, y, c]))
    out_sub = jax.block_until_ready(pallas_subtract([x, y]))
    out_mul = jax.block_until_ready(pallas_multiply([x, c]))
    out_div = jax.block_until_ready(pallas_divide([x, c]))

    np.testing.assert_allclose(np.asarray(out_add), np.asarray(x + y + c), rtol=1e-6, atol=1e-6)
    np.testing.assert_allclose(np.asarray(out_sub), np.asarray(x - y), rtol=1e-6, atol=1e-6)
    np.testing.assert_allclose(np.asarray(out_mul), np.asarray(x * c), rtol=1e-6, atol=1e-6)
    np.testing.assert_allclose(np.asarray(out_div), np.asarray(x / c), rtol=1e-6, atol=1e-6)

    print("KERNEL_OK")
</pallas_src>

<mosaic_0001>
module attributes {stable_mosaic.version = 11 : i64} {
  func.func @_merge_kernel(%arg0: i32, %arg1: i32, %arg2: memref<2x4x256xf32, #tpu.memory_space<vmem>>, %arg3: memref<2x4x256xf32, #tpu.memory_space<vmem>>, %arg4: memref<1x4x1xf32, #tpu.memory_space<vmem>>, %arg5: memref<2x4x256xf32, #tpu.memory_space<vmem>>) attributes {dimension_semantics = [#tpu.dimension_semantics<parallel>, #tpu.dimension_semantics<parallel>], iteration_bounds = array<i64: 1, 1>, scalar_prefetch = 0 : i64, scratch_operands = 0 : i64, tpu.core_type = #tpu.core_type<tc>, window_params = [{transform_indices = @transform_0, window_bounds = array<i64: 2, 4, 256>}, {transform_indices = @transform_1, window_bounds = array<i64: 2, 4, 256>}, {pipeline_mode = #tpu.pipeline_mode<synchronous>, transform_indices = @transform_2, window_bounds = array<i64: 1, 4, 1>}, {transform_indices = @transform_3, window_bounds = array<i64: 2, 4, 256>}]} {
    %c0 = arith.constant 0 : index
    %c0_0 = arith.constant 0 : index
    %c0_1 = arith.constant 0 : index
    %0 = vector.load %arg2[%c0, %c0_0, %c0_1] : memref<2x4x256xf32, #tpu.memory_space<vmem>>, vector<2x4x256xf32>
    %c0_2 = arith.constant 0 : index
    %c0_3 = arith.constant 0 : index
    %c0_4 = arith.constant 0 : index
    %1 = vector.load %arg3[%c0_2, %c0_3, %c0_4] : memref<2x4x256xf32, #tpu.memory_space<vmem>>, vector<2x4x256xf32>
    %2 = arith.addf %0, %1 : vector<2x4x256xf32>
    %c0_5 = arith.constant 0 : index
    %c0_6 = arith.constant 0 : index
    %c0_7 = arith.constant 0 : index
    %3 = vector.load %arg4[%c0_5, %c0_6, %c0_7] : memref<1x4x1xf32, #tpu.memory_space<vmem>>, vector<1x4x1xf32>
    %4 = vector.broadcast %3 : vector<1x4x1xf32> to vector<2x4x256xf32>
    %5 = arith.addf %2, %4 : vector<2x4x256xf32>
    %c0_8 = arith.constant 0 : index
    %c0_9 = arith.constant 0 : index
    %c0_10 = arith.constant 0 : index
    %6 = vector.load %arg5[%c0_8, %c0_9, %c0_10] : memref<2x4x256xf32, #tpu.memory_space<vmem>>, vector<2x4x256xf32>
    tpu.vector_store %arg5[%c0_8, %c0_9, %c0_10], %5 {strides = array<i32>} : memref<2x4x256xf32, #tpu.memory_space<vmem>>, vector<2x4x256xf32>,
    return
  }
  func.func @transform_0(%arg0: i32, %arg1: i32) -> (i32, i32, i32) {
    %c0_i32 = arith.constant 0 : i32
    %c0_i32_0 = arith.constant 0 : i32
    return %arg0, %c0_i32, %arg1 : i32, i32, i32
  }
  func.func @transform_1(%arg0: i32, %arg1: i32) -> (i32, i32, i32) {
    %c0_i32 = arith.constant 0 : i32
    %c0_i32_0 = arith.constant 0 : i32
    return %arg0, %c0_i32, %arg1 : i32, i32, i32
  }
  func.func @transform_2(%arg0: i32, %arg1: i32) -> (i32, i32, i32) {
    %c0_i32 = arith.constant 0 : i32
    %c0_i32_0 = arith.constant 0 : i32
    %c0_i32_1 = arith.constant 0 : i32
    %c0_i32_2 = arith.constant 0 : i32
    return %c0_i32, %c0_i32_0, %c0_i32_1 : i32, i32, i32
  }
  func.func @transform_3(%arg0: i32, %arg1: i32) -> (i32, i32, i32) {
    %c0_i32 = arith.constant 0 : i32
    %c0_i32_0 = arith.constant 0 : i32
    return %arg0, %c0_i32, %arg1 : i32, i32, i32
  }
}

</mosaic_0001>

<bundles_post_ra>
// kernel: tpu_custom_call.1
= control target key start
LH: loop header
LB: loop body
LE: loop exit
PB: predicated region body
PF: predicated region fallthrough
CT: control target
= control target key end

     0   :  { %8 = vsyncpa [#allocation3], 0  ;;  %s239_s0 = inlined_call_operand.hbm [shape: f32[2,4,256], index: 0, kind: input, shape index: {}]   ;;  %s240_s1 = inlined_call_operand.hbm [shape: f32[2,4,256], index: 1, kind: input, shape index: {}]   ;;  %s241_s2 = inlined_call_operand.vmem [shape: f32[1,4,1], index: 2, kind: input, shape index: {}]   ;;  %s242_s3 = inlined_call_operand.hbm [shape: f32[2,4,256], index: 3, kind: output, shape index: {}]  }
   0x1   :  { %9 = vsyncpa [#allocation6], 0 }
   0x2   :  { %10 = vsyncpa [#allocation4], 0  ;;  %s164_s12 = smov [#allocation2]   ;;  %s92_s16 = scalar_lea.hbm %s239_s0, 256 }
   0x3   :  { %s16_s13 = sshll.u32 %s164_s12, 4  ;;  %p93_p0 = scmp.ne.s32.totalorder %s239_s0, %s92_s16  ;;  %s17_s13 = int_to_ptr.vmem [resolvable:$true] %s16_s13 }
   0x4   :  { %p96_p1 = scmp.lt.u32.totalorder %s92_s16, %s239_s0 }
   0x6   :  { %p98_p2 = pnand %p96_p1, %p93_p0 }
   0x8   :  { %101 = shalt.err (!%p98_p2)
}
   0x9   :  { %s102_s21 = scalar_lea.vmem %s17_s13, 256  ;;  %p107_p4 = scmp.lt.s32.totalorder %s17_s13, %s17_s13 }
   0xa   :  { %p103_p3 = scmp.ne.s32.totalorder %s17_s13, %s102_s21  ;;  %p108_p5 = scmp.lt.s32.totalorder %s102_s21, %s102_s21 }
   0xc   :  { %p109_p6 = por %p108_p5, %p107_p4 }
   0xe   :  { %p110_p7 = pnand %p109_p6, %p103_p3 }
  0x10   :  { %113 = shalt.err (!%p110_p7)
}
  0x11   :  { %s165_s22 = smov 128   ;;  %s166_s23 = smov 8  }
  0x12   :  { %22 = dma.hbm_to_vmem [thread:$0]  %s239_s0, 256, %s17_s13, [#allocation3], %s165_s22, %s165_s22, %s166_s23  }
  0x13   :  { %s167_s26 = smov [#allocation5]   ;;  %s114_s30 = scalar_lea.hbm %s240_s1, 256 }
  0x14   :  { %s28_s27 = sshll.u32 %s167_s26, 4  ;;  %p115_p8 = scmp.ne.s32.totalorder %s240_s1, %s114_s30  ;;  %s29_s27 = int_to_ptr.vmem [resolvable:$true] %s28_s27 }
  0x15   :  { %p118_p9 = scmp.lt.u32.totalorder %s114_s30, %s240_s1 }
  0x17   :  { %p120_p10 = pnand %p118_p9, %p115_p8 }
  0x19   :  { %123 = shalt.err (!%p120_p10)
}
  0x1a   :  { %s124_s8 = scalar_lea.vmem %s29_s27, 256  ;;  %p129_p12 = scmp.lt.s32.totalorder %s29_s27, %s29_s27 }
  0x1b   :  { %p125_p11 = scmp.ne.s32.totalorder %s29_s27, %s124_s8  ;;  %p130_p13 = scmp.lt.s32.totalorder %s124_s8, %s124_s8 }
  0x1d   :  { %p131_p0 = por %p130_p13, %p129_p12 }
  0x1f   :  { %p132_p1 = pnand %p131_p0, %p125_p11 }
  0x21   :  { %135 = shalt.err (!%p132_p1)
}
  0x22   :  { %34 = dma.hbm_to_vmem [thread:$0]  %s240_s1, 256, %s29_s27, [#allocation6], %s165_s22, %s165_s22, %s166_s23  }
  0x23   :  { %158 = dma.done.wait [#allocation3], 256  }
  0x24   :  { %159 = vsyncadd [#allocation3], 4294967040 }
  0x25   :  { %160 = dma.done.wait [#allocation6], 256  }
  0x26   :  { %161 = vsyncadd [#allocation6], 4294967040  ;;  %v168_v0 = vmov 0   ;;  %v49_v1 = vld [vmem:[%s241_s2] sm:$0xf]  ;;  %v57_v4 = vlaneseq  ;;  %v44_v8 = vld [vmem:[#allocation2 + $0x8] sm:$0xff] }
  0x27   :  { %91 = vset.pattern.permute.xlu0 %v168_v0  ;;  %v169_v2 = vmov 839922192   ;;  %v43_v7 = vld [vmem:[#allocation2] sm:$0xff]  ;;  %v45_v9 = vld [vmem:[#allocation5] sm:$0xff]  ;;  %v46_v10 = vld [vmem:[#allocation5 + $0x8] sm:$0xff]  ;;  %s170_s1 = smov [#allocation7]  }
  0x28   :  { %52 = vperm.xlu0 %91, %v49_v1   ;;  %v55_v3 = vunpack.c.l.s4 %v169_v2  ;;  %v58_v6 = vshrl.u32 %v57_v4, 7  ;;  %v47_v12 = vadd.f32 %v45_v9, %v43_v7  ;;  %v48_v13 = vadd.f32 %v46_v10, %v44_v8  ;;  %s71_s12 = sshll.u32 %s170_s1, 4  ;;  %s72_s12 = int_to_ptr.vmem [resolvable:$true] %s71_s12 }
  0x29   :  { %s136_s2 = scalar_lea.vmem %s72_s12, 256  ;;  %p141_p3 = scmp.lt.s32.totalorder %s72_s12, %s72_s12 }
  0x2a   :  { %v56_v5 = vunpack.c.0.s8 %v55_v3  ;;  %p137_p2 = scmp.ne.s32.totalorder %s72_s12, %s136_s2  ;;  %p142_p4 = scmp.lt.s32.totalorder %s136_s2, %s136_s2 }
  0x2c   :  { %v59_v11 = vsub.s32 %v56_v5, %v58_v6  ;;  %p143_p5 = por %p142_p4, %p141_p3 }
  0x2e   :  { %p144_p6 = pnand %p143_p5, %p137_p2 }
  0xa7   :  { %v53_v14 = vpop.permute.xlu0 %52 }
  0xa8   :  { %v60_v15 = vrot.slane %v53_v14, %v59_v11 }
  0xaa   :  { %v62_v16 = vadd.f32 %v60_v15, %v47_v12  ;;  %v63_v17 = vadd.f32 %v60_v15, %v48_v13 }
  0xac   :  { %64 = vst [vmem:[#allocation7] sm:$0xff] %v62_v16  ;;  %65 = vst [vmem:[#allocation7 + $0x8] sm:$0xff] %v63_v17 }
  0xad   :  { %147 = shalt.err (!%p144_p6)
}
  0xae   :  { %s148_s15 = scalar_lea.hbm %s242_s3, 256 }
  0xaf   :  { %p149_p7 = scmp.ne.s32.totalorder %s242_s3, %s148_s15  ;;  %p152_p8 = scmp.lt.u32.totalorder %s148_s15, %s242_s3 }
  0xb1   :  { %p154_p9 = pnand %p152_p8, %p149_p7 }
  0xb3   :  { %157 = shalt.err (!%p154_p9)
}
  0xb4   :  { %77 = dma.vmem_to_hbm [thread:$0]  %s72_s12, 256, %s242_s3, [#allocation4], %s165_s22, %s165_s22, %s166_s23  }
  0xb5   :  { %162 = dma.done.wait [#allocation4], 256  }
  0xb6   :  { %163 = vsyncadd [#allocation4], 4294967040 }
  0xb7   :  { %81 = vsyncpa [#allocation3], 1 }
  0xb8   :  { %82 = vsyncpa [#allocation6], 1 }
  0xb9   :  { %83 = vsyncpa [#allocation4], 1 }

</bundles_post_ra>
